<compile_context>
chip_gen: v7x
topology: tpu7x:2x2x1
jax: 0.10.0
libtpu: 0.0.40
codegen_flags: <defaults>
</compile_context>

<pallas_src>
import functools

import jax
import jax.numpy as jnp
import numpy as np
from jax.experimental import pallas as pl
from jax.experimental.pallas import tpu as pltpu


def _round_up(x, m):
    return -(-x // m) * m


def _convplus_kernel(*refs, k, width, two_blocks):
    """Computes one (batch n, row-tile t) output block of ConvPlus.

    Refs (two_blocks=True):  xa, xb, w, b, o    (xa = tile t, xb = tile t+1)
         (two_blocks=False): x,      w, b, o

    x blocks are flattened (C1p, Lwin) slabs of the zero-padded input; the
    output block is (1, C2, L) with L = block_h * W on the lane axis.
    """
    if two_blocks:
        xa_ref, xb_ref, w_ref, b_ref, o_ref = refs
        # Halo window [t*L, t*L + 2L) of the padded flattened input, assembled
        # from two lane-aligned, auto-pipelined block views (tiles t and t+1).
        slab = jnp.concatenate([xa_ref[0], xb_ref[0]], axis=1)
    else:
        x_ref, w_ref, b_ref, o_ref = refs
        slab = x_ref[0]

    p = k // 2
    lwin = slab.shape[1]               # multiple of 128 by construction
    L = o_ref.shape[2]                 # block_h * width  (lane-dense out tile)

    # Column index of every flattened output position (for W-boundary masks).
    col = jax.lax.broadcasted_iota(jnp.int32, (1, L), 1) % width

    # ---- im2col: stack the 2k-1 shifted views along the contraction axis ----
    patches = []
    # cv1 (k,1): vertical taps.  The centre tap (dh == p) also carries the fused
    # cv2 centre weight (added in the wrapper).  The H boundary is covered by
    # the zero halo rows, so no mask is needed here.
    for dh in range(k):
        s = dh * width
        v = slab if s == 0 else pltpu.roll(slab, lwin - s, axis=1)
        patches.append(v[:, :L])
    # cv2 (1,k): horizontal taps (centre already fused above).  Columns that
    # would cross a row edge are masked to zero.
    for dw in range(k):
        if dw == p:
            continue
        ox = dw - p
        s = p * width + ox
        v = pltpu.roll(slab, lwin - s, axis=1)[:, :L]
        keep = jnp.logical_and(col + ox >= 0, col + ox < width)
        patches.append(jnp.where(keep, v, 0))

    pmat = jnp.concatenate(patches, axis=0)            # ((2k-1)*C1p, L)
    pmat = pmat.astype(w_ref.dtype)                    # optional bf16 MXU path

    # One MXU contraction over all taps and (padded) input channels.
    acc = jnp.dot(w_ref[...], pmat, preferred_element_type=jnp.float32)
    acc = acc + b_ref[...]                             # (C2, 1) broadcast
    o_ref[0] = acc.astype(o_ref.dtype)


def _pick_block_h(H, W, p):
    # Largest row tile that divides H, keeps the flattened out tile a multiple
    # of 128 lanes and is at least as tall as the vertical halo.
    for th in (256, 128, 64, 32, 16, 8):
        if H % th == 0 and (th * W) % 128 == 0 and th >= 2 * p:
            return th
    return H


def conv_plus(x, w_cv1, b_cv1, w_cv2, b_cv2, k=3, *, block_h=None,
              compute_dtype=None, interpret=False):
    """ConvPlus forward.  x: (N, C1, H, W) NCHW; returns (N, C2, H, W)."""
    N, C1, H, W = x.shape
    C2 = w_cv1.shape[0]
    if k % 2 != 1:
        raise ValueError("ConvPlus same-size output requires odd k")
    p = k // 2
    if compute_dtype is None:
        compute_dtype = x.dtype

    # ---- tiling --------------------------------------------------------------
    if block_h is None:
        block_h = _pick_block_h(H, W, p)
    if H % block_h != 0:
        raise ValueError("block_h must divide H")
    n_t = H // block_h
    L = block_h * W                                  # flattened out tile (lanes)
    two_blocks = n_t >= 2
    if two_blocks and ((L % 128 != 0) or block_h < 2 * p):
        raise ValueError("row tiling needs block_h*W % 128 == 0 and block_h >= k-1")

    # ---- weights: fuse shared centre tap, stack all 2k-1 taps ---------------
    C1p = _round_up(C1, 8)                           # full sublane occupancy
    wv = w_cv1[:, :, :, 0]                           # (C2, C1, k) vertical  (k,1)
    wh = w_cv2[:, :, 0, :]                           # (C2, C1, k) horizontal (1,k)
    wv = wv.at[:, :, p].add(wh[:, :, p])             # fused centre tap
    if C1p != C1:
        cpad = ((0, 0), (0, C1p - C1), (0, 0))
        wv = jnp.pad(wv, cpad)
        wh = jnp.pad(wh, cpad)
    taps = [wv[:, :, i] for i in range(k)] + \
           [wh[:, :, j] for j in range(k) if j != p]
    w_stack = jnp.concatenate(taps, axis=1).astype(compute_dtype)  # (C2,(2k-1)*C1p)
    bias = (b_cv1 + b_cv2).astype(jnp.float32).reshape(C2, 1)

    # ---- input: single pad (halo rows as p*W zero lanes + channel round-up) --
    # No transposes; flattening H*W onto the lane axis is a free reshape.
    if two_blocks:
        total = (n_t + 1) * L                        # one extra tile of halo/zeros
    else:
        total = _round_up((H + 2 * p) * W, 128)
    x_flat = x.reshape(N, C1, H * W)
    x_pad = jnp.pad(
        x_flat, ((0, 0), (0, C1p - C1), (p * W, total - H * W - p * W)))

    kernel = functools.partial(_convplus_kernel, k=k, width=W,
                               two_blocks=two_blocks)
    kc = (2 * k - 1) * C1p

    if two_blocks:
        in_specs = [
            pl.BlockSpec((1, C1p, L), lambda n, t: (n, 0, t)),      # rows of tile t
            pl.BlockSpec((1, C1p, L), lambda n, t: (n, 0, t + 1)),  # halo rows below
            pl.BlockSpec((C2, kc), lambda n, t: (0, 0)),
            pl.BlockSpec((C2, 1), lambda n, t: (0, 0)),
        ]
        operands = (x_pad, x_pad, w_stack, bias)
    else:
        in_specs = [
            pl.BlockSpec((1, C1p, total), lambda n, t: (n, 0, 0)),
            pl.BlockSpec((C2, kc), lambda n, t: (0, 0)),
            pl.BlockSpec((C2, 1), lambda n, t: (0, 0)),
        ]
        operands = (x_pad, w_stack, bias)

    out_flat = pl.pallas_call(
        kernel,
        out_shape=jax.ShapeDtypeStruct((N, C2, H * W), x.dtype),
        grid_spec=pltpu.PrefetchScalarGridSpec(
            num_scalar_prefetch=0,
            grid=(N, n_t),
            in_specs=in_specs,
            out_specs=pl.BlockSpec((1, C2, L), lambda n, t: (n, 0, t)),
        ),
        compiler_params=pltpu.CompilerParams(
            dimension_semantics=("parallel", "parallel"),
            vmem_limit_bytes=32 * 1024 * 1024,
        ),
        interpret=interpret,
    )(*operands)

    return out_flat.reshape(N, C2, H, W)             # free reshape, already NCHW


def conv_plus_ref(x, w_cv1, b_cv1, w_cv2, b_cv2, k=3):
    """Pure-JAX reference matching PyTorch Conv2d semantics (NCHW)."""
    p = k // 2
    dn = ("NCHW", "OIHW", "NCHW")
    y1 = jax.lax.conv_general_dilated(
        x, w_cv1, window_strides=(1, 1), padding=((p, p), (0, 0)),
        dimension_numbers=dn)
    y2 = jax.lax.conv_general_dilated(
        x, w_cv2, window_strides=(1, 1), padding=((0, 0), (p, p)),
        dimension_numbers=dn)
    return (y1 + b_cv1[None, :, None, None]) + (y2 + b_cv2[None, :, None, None])


if __name__ == "__main__":
    # Small deterministic setup consistent with ConvPlus(c1=4, c2=8, k=3).
    N, C1, C2, H, W, K = 2, 4, 8, 16, 16, 3
    key = jax.random.PRNGKey(0)
    kx, kw1, kb1, kw2, kb2 = jax.random.split(key, 5)

    x = jax.random.normal(kx, (N, C1, H, W), dtype=jnp.float32)
    bound1 = 1.0 / np.sqrt(C1 * K * 1)
    bound2 = 1.0 / np.sqrt(C1 * 1 * K)
    w_cv1 = jax.random.uniform(kw1, (C2, C1, K, 1), jnp.float32, -bound1, bound1)
    b_cv1 = jax.random.uniform(kb1, (C2,), jnp.float32, -bound1, bound1)
    w_cv2 = jax.random.uniform(kw2, (C2, C1, 1, K), jnp.float32, -bound2, bound2)
    b_cv2 = jax.random.uniform(kb2, (C2,), jnp.float32, -bound2, bound2)

    ref = conv_plus_ref(x, w_cv1, b_cv1, w_cv2, b_cv2, k=K)

    # (1) f32, spatially tiled path (two row-tiles per image).
    out_tiled = jax.block_until_ready(
        conv_plus(x, w_cv1, b_cv1, w_cv2, b_cv2, k=K, block_h=8))
    np.testing.assert_allclose(np.asarray(out_tiled), np.asarray(ref),
                               atol=1e-4, rtol=1e-4)

    # (2) f32, single-window path (auto tile = whole image).
    out_full = jax.block_until_ready(
        conv_plus(x, w_cv1, b_cv1, w_cv2, b_cv2, k=K))
    np.testing.assert_allclose(np.asarray(out_full), np.asarray(ref),
                               atol=1e-4, rtol=1e-4)

    # (3) bf16 MXU operands, f32 accumulation -- looser tolerance.
    out_bf16 = jax.block_until_ready(
        conv_plus(x, w_cv1, b_cv1, w_cv2, b_cv2, k=K, block_h=8,
                  compute_dtype=jnp.bfloat16))
    np.testing.assert_allclose(np.asarray(out_bf16), np.asarray(ref),
                               atol=6e-2, rtol=6e-2)

    print("KERNEL_OK")
</pallas_src>

<mosaic_0001>
module attributes {stable_mosaic.version = 11 : i64} {
  func.func @_convplus_kernel(%arg0: i32, %arg1: i32, %arg2: memref<1x8x128xf32, #tpu.memory_space<vmem>>, %arg3: memref<1x8x128xf32, #tpu.memory_space<vmem>>, %arg4: memref<8x40xf32, #tpu.memory_space<vmem>>, %arg5: memref<8x1xf32, #tpu.memory_space<vmem>>, %arg6: memref<1x8x128xf32, #tpu.memory_space<vmem>>) attributes {dimension_semantics = [#tpu.dimension_semantics<parallel>, #tpu.dimension_semantics<parallel>], iteration_bounds = array<i64: 2, 2>, scalar_prefetch = 0 : i64, scratch_operands = 0 : i64, tpu.core_type = #tpu.core_type<tc>, window_params = [{transform_indices = @transform_0, window_bounds = array<i64: 1, 8, 128>}, {transform_indices = @transform_1, window_bounds = array<i64: 1, 8, 128>}, {pipeline_mode = #tpu.pipeline_mode<synchronous>, transform_indices = @transform_2, window_bounds = array<i64: 8, 40>}, {pipeline_mode = #tpu.pipeline_mode<synchronous>, transform_indices = @transform_3, window_bounds = array<i64: 8, 1>}, {transform_indices = @transform_4, window_bounds = array<i64: 1, 8, 128>}]} {
    %c0 = arith.constant 0 : index
    %c0_0 = arith.constant 0 : index
    %c0_1 = arith.constant 0 : index
    %0 = vector.load %arg2[%c0, %c0_0, %c0_1] : memref<1x8x128xf32, #tpu.memory_space<vmem>>, vector<1x8x128xf32>
    %1 = vector.shape_cast %0 : vector<1x8x128xf32> to vector<8x128xf32>
    %c0_2 = arith.constant 0 : index
    %c0_3 = arith.constant 0 : index
    %c0_4 = arith.constant 0 : index
    %2 = vector.load %arg3[%c0_2, %c0_3, %c0_4] : memref<1x8x128xf32, #tpu.memory_space<vmem>>, vector<1x8x128xf32>
    %3 = vector.shape_cast %2 : vector<1x8x128xf32> to vector<8x128xf32>
    %4 = tpu.concatenate %1, %3 in 1 : vector<8x128xf32>, vector<8x128xf32> -> vector<8x256xf32>
    %5 = tpu.iota {dimensions = array<i32: 1>} : vector<1x128xi32>
    %c16_i32 = arith.constant 16 : i32
    %c0_i32 = arith.constant 0 : i32
    %6 = arith.cmpi eq, %c16_i32, %c0_i32 : i32
    %c1_i32 = arith.constant 1 : i32
    %7 = arith.select %6, %c1_i32, %c16_i32 : i32
    %8 = vector.broadcast %7 : i32 to vector<1x128xi32>
    %9 = arith.remsi %5, %8 : vector<1x128xi32>
    %c0_i32_5 = arith.constant 0 : i32
    %10 = vector.broadcast %c0_i32_5 : i32 to vector<1x128xi32>
    %11 = arith.cmpi ne, %9, %10 : vector<1x128xi32>
    %c0_i32_6 = arith.constant 0 : i32
    %12 = vector.broadcast %c0_i32_6 : i32 to vector<1x128xi32>
    %13 = arith.cmpi slt, %9, %12 : vector<1x128xi32>
    %c0_i32_7 = arith.constant 0 : i32
    %14 = arith.cmpi slt, %7, %c0_i32_7 : i32
    %15 = vector.broadcast %14 : i1 to vector<1x128xi1>
    %16 = vector.broadcast %15 : vector<1x128xi1> to vector<1x128xi1>
    %17 = arith.xori %13, %16 : vector<1x128xi1>
    %18 = arith.andi %17, %11 : vector<1x128xi1>
    %19 = vector.broadcast %7 : i32 to vector<1x128xi32>
    %20 = arith.addi %9, %19 : vector<1x128xi32>
    %21 = arith.select %18, %20, %9 : vector<1x128xi1>, vector<1x128xi32>
    %22 = vector.extract_strided_slice %4 {offsets = [0, 0], sizes = [8, 128], strides = [1, 1]} : vector<8x256xf32> to vector<8x128xf32>
    %c240_i32 = arith.constant 240 : i32
    %23 = tpu.dynamic_rotate %4 by %c240_i32 dim 1 : vector<8x256xf32>, i32 -> vector<8x256xf32>
    %24 = vector.extract_strided_slice %23 {offsets = [0, 0], sizes = [8, 128], strides = [1, 1]} : vector<8x256xf32> to vector<8x128xf32>
    %c224_i32 = arith.constant 224 : i32
    %25 = tpu.dynamic_rotate %4 by %c224_i32 dim 1 : vector<8x256xf32>, i32 -> vector<8x256xf32>
    %26 = vector.extract_strided_slice %25 {offsets = [0, 0], sizes = [8, 128], strides = [1, 1]} : vector<8x256xf32> to vector<8x128xf32>
    %c241_i32 = arith.constant 241 : i32
    %27 = tpu.dynamic_rotate %4 by %c241_i32 dim 1 : vector<8x256xf32>, i32 -> vector<8x256xf32>
    %28 = vector.extract_strided_slice %27 {offsets = [0, 0], sizes = [8, 128], strides = [1, 1]} : vector<8x256xf32> to vector<8x128xf32>
    %c-1_i32 = arith.constant -1 : i32
    %29 = vector.broadcast %c-1_i32 : i32 to vector<1x128xi32>
    %30 = arith.addi %21, %29 : vector<1x128xi32>
    %c0_i32_8 = arith.constant 0 : i32
    %31 = vector.broadcast %c0_i32_8 : i32 to vector<1x128xi32>
    %32 = arith.cmpi sge, %30, %31 : vector<1x128xi32>
    %c-1_i32_9 = arith.constant -1 : i32
    %33 = vector.broadcast %c-1_i32_9 : i32 to vector<1x128xi32>
    %34 = arith.addi %21, %33 : vector<1x128xi32>
    %c16_i32_10 = arith.constant 16 : i32
    %35 = vector.broadcast %c16_i32_10 : i32 to vector<1x128xi32>
    %36 = arith.cmpi slt, %34, %35 : vector<1x128xi32>
    %37 = arith.andi %32, %36 : vector<1x128xi1>
    %c0_i32_11 = arith.constant 0 : i32
    %38 = arith.sitofp %c0_i32_11 : i32 to f32
    %39 = vector.shape_cast %37 : vector<1x128xi1> to vector<1x128xi1>
    %40 = vector.broadcast %39 : vector<1x128xi1> to vector<8x128xi1>
    %41 = vector.broadcast %38 : f32 to vector<8x128xf32>
    %42 = arith.select %40, %28, %41 : vector<8x128xi1>, vector<8x128xf32>
    %c239_i32 = arith.constant 239 : i32
    %43 = tpu.dynamic_rotate %4 by %c239_i32 dim 1 : vector<8x256xf32>, i32 -> vector<8x256xf32>
    %44 = vector.extract_strided_slice %43 {offsets = [0, 0], sizes = [8, 128], strides = [1, 1]} : vector<8x256xf32> to vector<8x128xf32>
    %c1_i32_12 = arith.constant 1 : i32
    %45 = vector.broadcast %c1_i32_12 : i32 to vector<1x128xi32>
    %46 = arith.addi %21, %45 : vector<1x128xi32>
    %c0_i32_13 = arith.constant 0 : i32
    %47 = vector.broadcast %c0_i32_13 : i32 to vector<1x128xi32>
    %48 = arith.cmpi sge, %46, %47 : vector<1x128xi32>
    %c1_i32_14 = arith.constant 1 : i32
    %49 = vector.broadcast %c1_i32_14 : i32 to vector<1x128xi32>
    %50 = arith.addi %21, %49 : vector<1x128xi32>
    %c16_i32_15 = arith.constant 16 : i32
    %51 = vector.broadcast %c16_i32_15 : i32 to vector<1x128xi32>
    %52 = arith.cmpi slt, %50, %51 : vector<1x128xi32>
    %53 = arith.andi %48, %52 : vector<1x128xi1>
    %c0_i32_16 = arith.constant 0 : i32
    %54 = arith.sitofp %c0_i32_16 : i32 to f32
    %55 = vector.shape_cast %53 : vector<1x128xi1> to vector<1x128xi1>
    %56 = vector.broadcast %55 : vector<1x128xi1> to vector<8x128xi1>
    %57 = vector.broadcast %54 : f32 to vector<8x128xf32>
    %58 = arith.select %56, %44, %57 : vector<8x128xi1>, vector<8x128xf32>
    %59 = tpu.concatenate %22, %24, %26, %42, %58 in 0 : vector<8x128xf32>, vector<8x128xf32>, vector<8x128xf32>, vector<8x128xf32>, vector<8x128xf32> -> vector<40x128xf32>
    %c0_17 = arith.constant 0 : index
    %c0_18 = arith.constant 0 : index
    %60 = vector.load %arg4[%c0_17, %c0_18] : memref<8x40xf32, #tpu.memory_space<vmem>>, vector<8x40xf32>
    %cst = arith.constant dense<0.000000e+00> : vector<8x128xf32>
    %61 = tpu.matmul %60, %59, %cst {dimension_numbers = #tpu.dot_dimension_numbers<[1], [0], [0], [1], [0, 0, 1, 1], [], []>} : vector<8x40xf32>, vector<40x128xf32>, vector<8x128xf32> -> vector<8x128xf32>
    %c0_19 = arith.constant 0 : index
    %c0_20 = arith.constant 0 : index
    %62 = vector.load %arg5[%c0_19, %c0_20] : memref<8x1xf32, #tpu.memory_space<vmem>>, vector<8x1xf32>
    %63 = vector.broadcast %62 : vector<8x1xf32> to vector<8x128xf32>
    %64 = arith.addf %61, %63 : vector<8x128xf32>
    %c0_21 = arith.constant 0 : index
    %c0_22 = arith.constant 0 : index
    %c0_23 = arith.constant 0 : index
    %65 = vector.load %arg6[%c0_21, %c0_22, %c0_23] : memref<1x8x128xf32, #tpu.memory_space<vmem>>, vector<1x8x128xf32>
    %66 = vector.shape_cast %65 : vector<1x8x128xf32> to vector<8x128xf32>
    %67 = vector.shape_cast %64 : vector<8x128xf32> to vector<1x8x128xf32>
    tpu.vector_store %arg6[%c0_21, %c0_22, %c0_23], %67 {strides = array<i32>} : memref<1x8x128xf32, #tpu.memory_space<vmem>>, vector<1x8x128xf32>,
    return
  }
  func.func @transform_0(%arg0: i32, %arg1: i32) -> (i32, i32, i32) {
    %c0_i32 = arith.constant 0 : i32
    %c0_i32_0 = arith.constant 0 : i32
    return %arg0, %c0_i32, %arg1 : i32, i32, i32
  }
  func.func @transform_1(%arg0: i32, %arg1: i32) -> (i32, i32, i32) {
    %c1_i32 = arith.constant 1 : i32
    %0 = arith.addi %arg1, %c1_i32 : i32
    %c0_i32 = arith.constant 0 : i32
    %c0_i32_0 = arith.constant 0 : i32
    return %arg0, %c0_i32, %0 : i32, i32, i32
  }
  func.func @transform_2(%arg0: i32, %arg1: i32) -> (i32, i32) {
    %c0_i32 = arith.constant 0 : i32
    %c0_i32_0 = arith.constant 0 : i32
    %c0_i32_1 = arith.constant 0 : i32
    return %c0_i32, %c0_i32_0 : i32, i32
  }
  func.func @transform_3(%arg0: i32, %arg1: i32) -> (i32, i32) {
    %c0_i32 = arith.constant 0 : i32
    %c0_i32_0 = arith.constant 0 : i32
    %c0_i32_1 = arith.constant 0 : i32
    return %c0_i32, %c0_i32_0 : i32, i32
  }
  func.func @transform_4(%arg0: i32, %arg1: i32) -> (i32, i32, i32) {
    %c0_i32 = arith.constant 0 : i32
    %c0_i32_0 = arith.constant 0 : i32
    return %arg0, %c0_i32, %arg1 : i32, i32, i32
  }
}

</mosaic_0001>

<bundles_post_ra>
// kernel: tpu_custom_call.1
= control target key start
LH: loop header
LB: loop body
LE: loop exit
PB: predicated region body
PF: predicated region fallthrough
CT: control target
= control target key end

     0   :  { %s1272_s0 = inlined_call_operand.hbm [shape: f32[2,8,384], index: 0, kind: input, shape index: {}]   ;;  %s1273_s1 = inlined_call_operand.hbm [shape: f32[2,8,384], index: 1, kind: input, shape index: {}]   ;;  %s1274_s2 = inlined_call_operand.vmem [shape: f32[8,40], index: 2, kind: input, shape index: {}]   ;;  %s1275_s3 = inlined_call_operand.vmem [shape: f32[8,1], index: 3, kind: input, shape index: {}]   ;;  %s1276_s4 = inlined_call_operand.hbm [shape: f32[2,8,256], index: 4, kind: output, shape index: {}]  }
   0x1   :  { %1289 = sst [smem:[#allocation16_spill]] %s1272_s0 }
   0x2   :  { %1290 = sst [smem:[#allocation17_spill]] %s1276_s4 }
   0x3   :  { %9 = vsyncpa [#allocation3], 0 }
   0x4   :  { %11 = vsyncpa [#allocation3 + $0x1], 0 }
   0x5   :  { %12 = vsyncpa [#allocation6], 0 }
   0x6   :  { %14 = vsyncpa [#allocation6 + $0x1], 0 }
   0x7   :  { %15 = vsyncpa [#allocation4], 0 }
   0x8   :  { %17 = vsyncpa [#allocation4 + $0x1], 0  ;;  %s945_s15 = smov 0   ;;  %s947_s16 = smov 0  }
   0x9   :  { %s949_s17 = smov 0   ;;  %s951_s18 = smov 0  }
   0xa   :  { %s953_s19 = smov 0   ;;  %s955_s20 = smov 0  }
   0xb   :  { %s957_s21 = smov 0   ;;  %s959_s22 = smov 0  }
   0xc   :  { %s961_s23 = smov 0   ;;  %s963_s24 = smov 0  }
   0xd   :  { %s965_s25 = smov 0  }
   0xe LB: > { %1291 = sst [smem:[#allocation11_spill]] %s898_s23  ;;  %s539_s26 = sadd.s32 4294967295, %s906_s25   ;;  %s906_s25 = sphi %s965_s25, %s23_s25   ;;  %s902_s24 = sphi %s963_s24, %s1328_s24   ;;  %s898_s23 = sphi %s961_s23, %s1320_s23   ;;  %s894_s22 = sphi %s959_s22, %s1319_s22   ;;  %s890_s21 = sphi %s957_s21, %s1318_s21   ;;  %s886_s20 = sphi %s955_s20, %s1327_s20   ;;  %s882_s19 = sphi %s953_s19, %s1326_s19   ;;  %s878_s18 = sphi %s951_s18, %s1325_s18   ;;  %s874_s17 = sphi %s949_s17, %s1324_s17   ;;  %s870_s16 = sphi %s947_s16, %s1323_s16   ;;  %s866_s15 = sphi %s945_s15, %s1322_s15  }
   0xf   : > { %1292 = sst [smem:[#allocation12_spill]] %s902_s24  ;;  %s540_s27 = sadd.s32 4294967294, %s906_s25  }
  0x10   : > { %s32_s28 = sadd.s32 1, %s898_s23  ;;  %s35_s29 = sadd.s32 1, %s902_s24 }
  0x11   : > { %p33_p0 = scmp.ge.s32.totalorder %s32_s28, 2  ;;  %s44_s30 = sadd.s32 1, %s886_s20 }
  0x12   : > { %p51_p1 = scmp.ne.s32.totalorder %s886_s20, %s882_s19  ;;  %p1284_p2 = scmp.eq.s32.totalorder %s906_s25, 0 }
  0x13   : > { %s1008_s5 = scalar_select %p33_p0, 0, %s32_s28  }
  0x14   : > { %s1330_s29 = smov (!%p33_p0, %s35_s29), %s902_s24  ;;  %p1018_p3 = por %p1284_p2, %p51_p1 }
  0x15   : > { %1293 = sst [smem:[#allocation13_spill]] %s1008_s5  ;;  %s40_s6 = ssub.s32 %s898_s23, %s1008_s5 }
  0x16   : > { %p37_p4 = scmp.ge.s32.totalorder %s1330_s29, 2  ;;  %p57_p5 = scmp.ne.s32.totalorder %s882_s19, %s878_s18 }
  0x17   : > { %p1024_p6 = scmp.eq.s32.totalorder %s539_s26, 0  ;;  %s68_s9 = sadd.s32 1, %s1008_s5 }
  0x18   : > { %s1332_s29 = smov (%p37_p4, %s1330_s29), 0  ;;  %s70_s11 = ssub.s32 %s32_s28, %s68_s9 }
  0x19   : > { %s1295_s8 = scalar_select %p1024_p6, 1, 0 }
  0x1a   : > { %1296 = sst [smem:[#allocation14_spill]] %s1332_s29  ;;  %p1036_p7 = por %p1024_p6, %p57_p5 }
  0x1b   : > { %s39_s12 = ssub.s32 %s902_s24, %s1332_s29  ;;  %p155_p8 = scmp.eq.s32.totalorder %s539_s26, 3 }
  0x1c   : > { %s1297_s10 = scalar_select %p1036_p7, 1, 0 }
  0x1d   : > { %s41_s13 = sor.u32 %s40_s6, %s39_s12  ;;  %s71_s14 = sor.u32 %s70_s11, %s39_s12 }
  0x1e   : > { %p42_p9 = scmp.eq.s32.totalorder %s41_s13, 0  ;;  %p1042_p10 = scmp.eq.s32.totalorder %s71_s14, 0 }
  0x1f   : > { %p1049_p11 = por %p155_p8, %p51_p1  ;;  %p161_p12 = scmp.eq.s32.totalorder %s540_s27, 3 }
  0x20   : > { %s1054_s28 = scalar_select %p42_p9, %s886_s20, %s44_s30  }
  0x21   : > { %s1299_s4 = scalar_select %p1049_p11, 1, 0 }
  0x22   : > { %1300 = sst [smem:[#allocation15_spill]] %s1054_s28  ;;  %p1059_p13 = por %p161_p12, %p57_p5 }
  0x23   : > { %p1283_p0 = scmp.lt.s32.totalorder %s906_s25, 4  ;;  %s187_s6 = sand.u32 1, %s886_s20  }
  0x24   : > { %s1301_s26 = scalar_select %p1059_p13, 1, 0 }
  0x25   : > { %s543_s9 = sshll.u32 %s187_s6, 3  ;;  %s585_s11 = smul.u32 3, %s902_s24 }
  0x26   : > { %s191_s12 = scalar_lea.vmem [#allocation2], %s543_s9  ;;  %p1070_p1 = pnand %p1283_p0, %p1018_p3 }
  0x27   : > { %s200_s13 = sshll.u32 %s191_s12, 4  ;;  %s1075_s27 = sadd.s32 %s898_s23, %s585_s11  ;;  %s1077_s13 = int_to_ptr.vmem [resolvable:$true] %s200_s13 }
  0x28   : > { %s1282_s30 = sshll.u32 %s1075_s27, 7  ;;  %s1303_s0 = sld [smem:[#allocation16_spill]] }
  0x29   : > { %s188_s7 = scalar_lea.sflag [#allocation3], %s187_s6  ;;  %p721_p5 = pneg %p1070_p1 }
  0x2e   : > { %s1085_s9 = scalar_lea.hbm %s1303_s0, %s1282_s30  ;;  %s724_s24 = scalar_lea.hbm %s1303_s0, 768 }
  0x2f   : > { %s719_s12 = scalar_lea.hbm %s1085_s9, 128  ;;  %p725_p12 = scmp.lt.u32.totalorder %s1085_s9, %s1303_s0 }
  0x30   : > { %p720_p4 = scmp.ne.s32.totalorder %s1085_s9, %s719_s12  ;;  %p726_p0 = scmp.lt.u32.totalorder %s724_s24, %s719_s12 }
  0x31   : > { %p728_p3 = scmp.lt.u32.totalorder %s719_s12, %s1085_s9 }
  0x32   : > { %p722_p8 = pnand %p721_p5, %p720_p4  ;;  %p727_p2 = por %p726_p0, %p725_p12 }
  0x34   : > { %p723_p9 = pneg %p722_p8  ;;  %p729_p13 = por %p728_p3, %p727_p2 }
  0x36   : > { %p730_p11 = pnand %p729_p13, %p723_p9 }
  0x38   : > { %733 = shalt.err (!%p730_p11)
}
  0x39   : > { %s734_s6 = scalar_lea.vmem %s1077_s13, 128  ;;  %s908_s23 = smov [#allocation2]  }
  0x3a   : > { %p735_p4 = scmp.ne.s32.totalorder %s1077_s13, %s734_s6  ;;  %s739_s11 = sshll.u32 %s908_s23, 4  ;;  %s740_s11 = int_to_ptr.vmem [resolvable:$false] %s739_s11 }
  0x3b   : > { %s741_s30 = scalar_lea.vmem %s740_s11, 256  ;;  %p742_p6 = scmp.lt.s32.totalorder %s1077_s13, %s740_s11 }
  0x3c   : > { %p737_p8 = pnand %p735_p4, %p721_p5  ;;  %p743_p0 = scmp.lt.s32.totalorder %s741_s30, %s734_s6 }
  0x3e   : > { %p738_p7 = pneg %p737_p8  ;;  %p744_p12 = por %p743_p0, %p742_p6 }
  0x40   : > { %p745_p2 = pnand %p744_p12, %p738_p7 }
  0x42   : > { %748 = shalt.err (!%p745_p2)
}
  0x43   : > { %595 = dma.hbm_to_vmem [thread:$0]  (!%p1070_p1), %s1085_s9, 128, %s1077_s13, %s188_s7  }
  0x44   : > { %p226_p6 = scmp.lt.s32.totalorder %s906_s25, 5  ;;  %p1304_p7 = scmp.ge.s32.totalorder %s906_s25, 1 }
  0x45   : > { %s74_s12 = sadd.s32 1, %s874_s17  ;;  %p81_p13 = scmp.ne.s32.totalorder %s874_s17, %s870_s16 }
  0x46   : > { %p1116_p11 = pnand %p1304_p7, %p226_p6  ;;  %p1306_p3 = scmp.eq.s32.totalorder %s906_s25, 0 }
  0x47   : > { %s1126_s24 = scalar_select %p1042_p10, %s874_s17, %s74_s12  }
  0x48   : > { %p83_p5 = por %p81_p13, %p1306_p3  ;;  %p87_p9 = scmp.ne.s32.totalorder %s870_s16, %s866_s15 }
  0x49   : > { %s207_s29 = sand.u32 1, %s874_s17   ;;  %s1307_s6 = sshll.u32 %s1075_s27, 7 }
  0x4a   : > { %s468_s13 = scalar_lea.hbm %s1273_s1, %s1307_s6  ;;  %p1308_p1 = scmp.ne.s32.totalorder %s1295_s8, 0 }
  0x4b   : > { %s545_s7 = sshll.u32 %s207_s29, 3  ;;  %s1144_s30 = scalar_lea.hbm %s468_s13, 128 }
  0x4c   : > { %p1140_p4 = por %p87_p9, %p1308_p1  ;;  %p1310_p8 = scmp.lt.s32.totalorder %s906_s25, 4 }
  0x4d   : > { %s211_s5 = scalar_lea.vmem [#allocation5], %s545_s7  ;;  %s208_s8 = scalar_lea.sflag [#allocation6], %s207_s29 }
  0x4e   : > { %s1309_s9 = scalar_select %p1140_p4, 1, 0 }
  0x4f   : > { %p1148_p10 = pnand %p1310_p8, %p83_p5  ;;  %s221_s27 = sshll.u32 %s211_s5, 4  ;;  %s1152_s27 = int_to_ptr.vmem [resolvable:$true] %s221_s27 }
  0x50   : > { %s779_s12 = scalar_lea.hbm %s468_s13, 256  ;;  %s754_s11 = scalar_lea.hbm %s1273_s1, 768 }
  0x51   : > { %p750_p0 = scmp.ne.s32.totalorder %s1144_s30, %s779_s12  ;;  %p751_p12 = pneg %p1148_p10 }
  0x52   : > { %p755_p7 = scmp.lt.u32.totalorder %s1144_s30, %s1273_s1  ;;  %p756_p13 = scmp.lt.u32.totalorder %s754_s11, %s779_s12 }
  0x53   : > { %p752_p2 = pnand %p751_p12, %p750_p0  ;;  %p758_p5 = scmp.lt.u32.totalorder %s779_s12, %s1144_s30 }
  0x54   : > { %p757_p3 = por %p756_p13, %p755_p7 }
  0x55   : > { %p753_p6 = pneg %p752_p2 }
  0x56   : > { %p759_p9 = por %p758_p5, %p757_p3 }
  0x58   : > { %p760_p1 = pnand %p759_p9, %p753_p6 }
  0x5a   : > { %763 = shalt.err (!%p760_p1)
}
  0x5b   : > { %s764_s29 = scalar_lea.vmem %s1152_s27, 128  ;;  %s909_s13 = smov [#allocation5]  }
  0x5c   : > { %p765_p8 = scmp.ne.s32.totalorder %s1152_s27, %s764_s29  ;;  %s769_s7 = sshll.u32 %s909_s13, 4  ;;  %s770_s7 = int_to_ptr.vmem [resolvable:$false] %s769_s7 }
  0x5d   : > { %s771_s0 = scalar_lea.vmem %s770_s7, 256  ;;  %p772_p4 = scmp.lt.s32.totalorder %s1152_s27, %s770_s7 }
  0x5e   : > { %p767_p0 = pnand %p765_p8, %p751_p12  ;;  %p773_p7 = scmp.lt.s32.totalorder %s771_s0, %s764_s29 }
  0x60   : > { %p768_p2 = pneg %p767_p0  ;;  %p774_p13 = por %p773_p7, %p772_p4 }
  0x62   : > { %p775_p3 = pnand %p774_p13, %p768_p2 }
  0x64   : > { %778 = shalt.err (!%p775_p3)
}
  0x65   : > { %598 = dma.hbm_to_vmem [thread:$0]  (!%p1148_p10), %s1144_s30, 128, %s1152_s27, %s208_s8  }
  0x66   : > { %230 = sbr.rel (%p1116_p11) target bundleno = 474 (0x1da), region = 36  ;;  %s1181_s28 = sand.u32 (!%p1116_p11), 1, %s882_s19  }
  0x67   : > { %s548_s5 = sshll.u32 (!%p1116_p11), %s1181_s28, 3  ;;  %s233_s12 = scalar_lea.sflag (!%p1116_p11), [#allocation3], %s1181_s28 }
  0x68   : > { %s236_s6 = scalar_lea.vmem (!%p1116_p11), [#allocation2], %s548_s5  ;;  %p1312_p4 = scmp.ne.s32.totalorder (!%p1116_p11), %s1297_s10, 0 }
  0x6d   : > { %853 = dma.done.wait (%p1312_p4), %s233_s12, 128  }
  0x6e   : > { %855 = vsyncadd (%p1312_p4), %s233_s12, 4294967168  ;;  %s241_s14 = sand.u32 1, %s870_s16   ;;  %p1313_p11 = scmp.ne.s32.totalorder %s1309_s9, 0 }
  0x6f   : > { %s549_s30 = sshll.u32 %s241_s14, 3  ;;  %s242_s15 = scalar_lea.sflag [#allocation6], %s241_s14 }
  0x70   : > { %s245_s27 = scalar_lea.vmem [#allocation5], %s549_s30 }
  0x71   : > { %857 = dma.done.wait (%p1313_p11), %s242_s15, 128  }
  0x72   : > { %859 = vsyncadd (%p1313_p11), %s242_s15, 4294967168  ;;  %v910_v0 = vmov 0.0|0.0   ;;  %v276_v1 = vld [vmem:[%s236_s6] sm:$0xff]  ;;  %v277_v2 = vld [vmem:[%s245_s27] sm:$0xff]  ;;  %s911_s8 = smov 112   ;;  %s912_s10 = smov 113   ;;  %v278_v7 = vlaneseq }
  0x73   : > { %578 = vmatprep.subr.bf16.mxu0 %v910_v0  ;;  %v702_v3 = vpack.i.bf16 %v277_v2, %v276_v1  ;;  %vm913_vm0 = vmmov 0   ;;  %v914_v4 = vmov 0.0   ;;  %v915_v5 = vmov 0   ;;  %s916_s23 = smov 96   ;;  %s917_s11 = smov 111   ;;  %v331_v6 = vld [vmem:[%s1275_s3] sm:$0xff] }
  0x74   : > { %575 = vmatprep.mubr.msk.f32.mxu0 %vm913_vm0, %v914_v4  ;;  %717 = vset.pattern.permute.xlu1 %v915_v5  ;;  %v279_v8 = vand.u32 127, %v278_v7  ;;  %vm918_vm5 = vmmov 1   ;;  %v330_v29 = vld [vmem:[%s1274_s2] sm:$0xff]  ;;  %vm337_vm9 = vcmask 326656   ;;  %s555_s0 = sshll.u32 %s894_s22, 1  ;;  %s274_s14 = scalar_lea.vmem [#allocation7], %s548_s5 }
  0x75   : > { %703 = vrot.lane.b32.xlu0 %v702_v3, %s911_s8  ;;  %713 = vrot.lane.b32.xlu1 %v702_v3, %s912_s10  ;;  %s424_s12 = sadd.s32 %s890_s21, %s555_s0  ;;  %s428_s30 = sshll.u32 %s274_s14, 4  ;;  %s1211_s30 = int_to_ptr.vmem [resolvable:$true] %s428_s30 }
  0x76   : > { %718 = vset.pattern.permute.xlu0 %v915_v5  ;;  %v284_v9 = vand.u32 15, %v279_v8  ;;  %vm296_vm1 = vcmp.lt.s32.totalorder %v279_v8, 112  ;;  %vm308_vm2 = vcmp.lt.s32.totalorder %v279_v8, 113  ;;  %vm302_vm3 = vcmp.lt.s32.totalorder %v279_v8, 96  ;;  %s556_s6 = sshll.u32 %s424_s12, 7  ;;  %s1314_s8 = sld [smem:[#allocation17_spill]] }
  0x77   : > { %vm321_vm7 = vcmp.lt.s32.totalorder %v279_v8, 111  ;;  %s413_s21 = scalar_lea.sflag [#allocation4], %s1181_s28  ;;  %s780_s22 = scalar_lea.vmem %s1211_s30, 128 }
  0x78   : > { %v310_v12 = vadd.s32 4294967295, %v284_v9  ;;  %v323_v24 = vadd.s32 1, %v284_v9  ;;  %p781_p10 = scmp.ne.s32.totalorder %s1211_s30, %s780_s22  ;;  %p1315_p12 = scmp.ne.s32.totalorder %s1299_s4, 0 }
  0x79   : > { %708 = vrot.lane.b32.xlu0 %v702_v3, %s916_s23  ;;  %317 = vrot.lane.b32.xlu1 %v276_v1, %s917_s11  ;;  %s919_s5 = smov [#allocation7]  }
  0x7a   : > { %vm311_vm4 = vcmp.ge.s32.totalorder %v310_v12, 0  ;;  %vm325_vm8 = vcmp.lt.s32.totalorder %v323_v24, 16  ;;  %p782_p6 = pnand %p781_p10, %p1315_p12  ;;  %s784_s23 = sshll.u32 %s919_s5, 4  ;;  %s785_s23 = int_to_ptr.vmem [resolvable:$false] %s784_s23 }
  0x7b   : > { %vm583_vm6 = vmpackc.low %vm311_vm4, %vm918_vm5  ;;  %p787_p9 = scmp.lt.s32.totalorder %s1211_s30, %s785_s23 }
  0x7c   : > { %s1209_s10 = scalar_lea.hbm %s1314_s8, %s556_s6  ;;  %p783_p5 = pneg %p782_p6 }
  0x7d   : > { %319 = vrot.lane.b32.xlu0 %v277_v2, %s917_s11  ;;  %334 = vperm.xlu1 %717, %v331_v6   ;;  %s786_s11 = scalar_lea.vmem %s785_s23, 256 }
  0x7e   : > { %p788_p1 = scmp.lt.s32.totalorder %s786_s11, %s780_s22 }
  0x80   : > { %p789_p8 = por %p788_p1, %p787_p9 }
  0x82   : > { %p790_p0 = pnand %p789_p8, %p783_p5 }
  0xe7   : > { %v704_v10 = vpop.permute.xlu0 %703  ;;  %v714_v11 = vpop.permute.xlu1 %713 }
  0xe8   : > { %v706_v13 = vunpack.i.h.bf16 %v704_v10  ;;  %v705_v14 = vunpack.i.l.bf16 %v704_v10  ;;  %v716_v15 = vunpack.i.h.bf16 %v714_v11  ;;  %v715_v16 = vunpack.i.l.bf16 %v714_v11 }
  0xea   : > { %v297_v17 = vsel %vm296_vm1, %v705_v14, %v706_v13  ;;  %v309_v20 = vsel %vm308_vm2, %v715_v16, %v716_v15 }
  0xeb   : > { %v709_v18 = vpop.permute.xlu0 %708  ;;  %v579_v19 = vpack.c.bf16 %v297_v17, %v276_v1  ;;  %v318_v26 = vpop.permute.xlu1 %317 }
  0xec   : > { %v711_v21 = vunpack.i.h.bf16 %v709_v18  ;;  %v710_v22 = vunpack.i.l.bf16 %v709_v18 }
  0xed   : > { %580 = vmatpush3.bf16.msra.mxu0 %v579_v19 }
  0xee   : > { %v303_v23 = vsel %vm302_vm3, %v710_v22, %v711_v21  ;;  %581 = vmatprep.subr.bf16.mxu0 %v910_v0 }
  0xef   : > { %v582_v25 = vpack.c.bf16 %v309_v20, %v303_v23  ;;  %v320_v27 = vpop.permute.xlu0 %319 }
  0xf0   : > { %v322_v28 = vsel %vm321_vm7, %v318_v26, %v320_v27 }
  0xf1   : > { %584 = vmatpush3.bf16.msk.msra.mxu0 %vm583_vm6, %v582_v25 }
  0xf2   : > { %573 = vmatprep.subr.mxu0 %v914_v4 }
  0xf5   : > { %574 = vmatpush3.msk.msra.mxu0 %vm325_vm8, %v322_v28 }
  0xf6   : > { %576 = vmatmul.mubr.msk.f32.vlgmr.msra.gmra.mrb[0].mxu0 %vm337_vm9, %v330_v29 }
  0xfc   : > { %v335_v30 = vpop.permute.xlu1 %334 }
 0x1c9   : > { %v407_v31 = vpop.f32.mrb[0].mxu0 }
 0x1ca   : > { %v408_v32 = vadd.f32 %v407_v31, %v335_v30  ;;  %v577_v33 = vpop.f32.mrb[1].mxu0 }
 0x1cc   : > { %411 = vst [vmem:[%s274_s14] sm:$0xff] %v408_v32 }
 0x1cd   : > { %793 = shalt.err (!%p790_p0)
}
 0x1ce   : > { %s794_s28 = scalar_lea.hbm %s1209_s10, 128  ;;  %s798_s13 = scalar_lea.hbm %s1314_s8, 512 }
 0x1cf   : > { %p795_p2 = scmp.ne.s32.totalorder %s1209_s10, %s794_s28  ;;  %p799_p3 = scmp.lt.u32.totalorder %s1209_s10, %s1314_s8 }
 0x1d0   : > { %p800_p4 = scmp.lt.u32.totalorder %s798_s13, %s794_s28  ;;  %p802_p10 = scmp.lt.u32.totalorder %s794_s28, %s1209_s10 }
 0x1d1   : > { %p796_p7 = pnand %p795_p2, %p1315_p12 }
 0x1d2   : > { %p801_p11 = por %p800_p4, %p799_p3 }
 0x1d3   : > { %p797_p13 = pneg %p796_p7 }
 0x1d4   : > { %p803_p6 = por %p802_p10, %p801_p11 }
 0x1d6   : > { %p804_p5 = pnand %p803_p6, %p797_p13 }
 0x1d8   : > { %807 = shalt.err (!%p804_p5)
}
 0x1d9   : > { %590 = dma.vmem_to_hbm [thread:$0]  (%p1315_p12), %s1211_s30, 128, %s1209_s10, %s413_s21  }
 0x1da PF: > { %p604_p9 = scmp.ge.s32.totalorder %s906_s25, 2  ;;  %s440_s12 = sand.u32 1, %s878_s18  }
 0x1db   : > { %p1316_p1 = scmp.ne.s32.totalorder %s1301_s26, 0  ;;  %s441_s6 = scalar_lea.sflag [#allocation4], %s440_s12 }
 0x1dd   : > { %p600_p8 = pnand %p604_p9, %p1316_p1 }
 0x1df   : > { %861 = dma.done.wait (!%p600_p8), %s441_s6, 128  }
 0x1e0   : > { %863 = vsyncadd (!%p600_p8), %s441_s6, 4294967168  ;;  %s23_s25 = sadd.s32 1, %s906_s25   ;;  %s1317_s4 = sld [smem:[#allocation15_spill]] }
 0x1e1   : > { %p20_p0 = scmp.ge.s32.totalorder %s23_s25, 6   ;;  %s1318_s21 = sld [smem:[#allocation11_spill]] }
 0x1e2   : > { %s1319_s22 = sld [smem:[#allocation12_spill]]  ;;  %s1320_s23 = sld [smem:[#allocation13_spill]] }
 0x1e3   : > { %s1321_s14 = sld [smem:[#allocation14_spill]]  ;;  %s1322_s15 = smov %s870_s16 }
 0x1e4   : > { %s1323_s16 = smov %s874_s17  ;;  %s1324_s17 = smov %s1126_s24 }
 0x1e5   : > { %s1325_s18 = smov %s882_s19  ;;  %s1326_s19 = smov %s886_s20 }
 0x1e6   : > { %s1327_s20 = smov %s1317_s4  ;;  %22 = sbr.rel (!%p20_p0) target bundleno = 14 (0xe), region = 94 }
 0x1e9   : > { %s1328_s24 = smov %s1321_s14 }
 0x1ed   :  { %446 = vsyncpa [#allocation3], 1 }
 0x1ee   :  { %448 = vsyncpa [#allocation3 + $0x1], 1 }
 0x1ef   :  { %449 = vsyncpa [#allocation6], 1 }
 0x1f0   :  { %451 = vsyncpa [#allocation6 + $0x1], 1 }
 0x1f1   :  { %452 = vsyncpa [#allocation4], 1 }
 0x1f2   :  { %454 = vsyncpa [#allocation4 + $0x1], 1 }

</bundles_post_ra>
